<compile_context>
chip_gen: v7x
topology: tpu7x:2x2x1
jax: 0.10.0
libtpu: 0.0.40
codegen_flags: <defaults>
</compile_context>

<pallas_src>
import functools

import jax
import jax.numpy as jnp
from jax import lax
from jax.experimental import pallas as pl
from jax.experimental.pallas import tpu as pltpu


# ---------------------------------------------------------------------------
# Stage 1: conv1/conv2/conv3 (+folded BN, ReLU) and running global max-pool.
# ---------------------------------------------------------------------------
def _conv_pool_kernel(x_ref,
                      cw1, cb1, cw2, cb2, cw3, cb3,
                      g_ref, *, n_points):
    j = pl.program_id(1)
    tn = x_ref.shape[1]

    @pl.when(j == 0)
    def _():
        g_ref[...] = jnp.full(g_ref.shape, -jnp.inf, dtype=g_ref.dtype)

    x = x_ref[0]                                               # (TN, k)

    # conv1 (1x1) + bn1 + relu -> (TN, 64)   (BN scale folded into cw1)
    h = jnp.dot(x, cw1[...], preferred_element_type=jnp.float32)
    h = jnp.maximum(h + cb1[...], 0.0)
    # conv2 (1x1) + bn2 + relu -> (TN, 128)
    h = jnp.dot(h, cw2[...], preferred_element_type=jnp.float32)
    h = jnp.maximum(h + cb2[...], 0.0)
    # conv3 (1x1) + bn3 + relu -> (TN, 1024)
    h = jnp.dot(h, cw3[...], preferred_element_type=jnp.float32)
    h = jnp.maximum(h + cb3[...], 0.0)

    # Mask zero-padded rows in the last point tile so they never win the max.
    row = j * tn + lax.broadcasted_iota(jnp.int32, (tn, 1), 0)
    h = jnp.where(row < n_points, h, -jnp.inf)

    # running max-pool over points (torch.max(x, 2))
    g_ref[0] = jnp.maximum(g_ref[0], jnp.max(h, axis=0, keepdims=True))


# ---------------------------------------------------------------------------
# Stage 2: fc1/fc2/fc3 head over the pooled (B, 1024) matrix.
# ---------------------------------------------------------------------------
def _fc_head_kernel(g_ref, fw1, fb1, fw2, fb2, fw3, fb3, out_ref):
    g = g_ref[...]                                             # (B, 1024)
    # fc1 + bn4 + relu -> (B, 512)
    f = jnp.dot(g, fw1[...], preferred_element_type=jnp.float32)
    f = jnp.maximum(f + fb1[...], 0.0)
    # fc2 + bn5 + relu -> (B, 256)
    f = jnp.dot(f, fw2[...], preferred_element_type=jnp.float32)
    f = jnp.maximum(f + fb2[...], 0.0)
    # fc3 -> (B, k*k); flattened identity is already folded into fb3.
    out_ref[...] = jnp.dot(f, fw3[...], preferred_element_type=jnp.float32) + fb3[...]


def _round_up(x, m):
    return (x + m - 1) // m * m


def stnkd_forward(x_bkn, params, *, tile_n=512):
    """x_bkn: (B, k, N) float32, PyTorch NCW layout.  Returns (B, k, k)."""
    B, k, N = x_bkn.shape
    (cw1, cb1, cw2, cb2, cw3, cb3, fw1, fb1, fw2, fb2, fw3, fb3) = params

    x_bnk = jnp.transpose(x_bkn, (0, 2, 1))                    # (B, N, k)

    assert tile_n % 8 == 0
    tn = min(tile_n, _round_up(N, 8))
    num_tiles = pl.cdiv(N, tn)
    n_pad = num_tiles * tn
    if n_pad != N:
        x_bnk = jnp.pad(x_bnk, ((0, 0), (0, n_pad - N), (0, 0)))

    full2 = lambda a: pl.BlockSpec(a.shape, lambda b, j: (0,) * a.ndim)

    g = pl.pallas_call(
        functools.partial(_conv_pool_kernel, n_points=N),
        out_shape=jax.ShapeDtypeStruct((B, 1, 1024), jnp.float32),
        grid_spec=pltpu.PrefetchScalarGridSpec(
            num_scalar_prefetch=0,
            grid=(B, num_tiles),
            in_specs=[
                pl.BlockSpec((1, tn, k), lambda b, j: (b, j, 0)),
                full2(cw1), full2(cb1),
                full2(cw2), full2(cb2),
                full2(cw3), full2(cb3),
            ],
            out_specs=pl.BlockSpec((1, 1, 1024), lambda b, j: (b, 0, 0)),
        ),
        compiler_params=pltpu.CompilerParams(
            dimension_semantics=("parallel", "arbitrary"),
        ),
    )(x_bnk, cw1, cb1, cw2, cb2, cw3, cb3)

    g = g.reshape(B, 1024)

    full1 = lambda a: pl.BlockSpec(a.shape, lambda i: (0,) * a.ndim)

    out = pl.pallas_call(
        _fc_head_kernel,
        out_shape=jax.ShapeDtypeStruct((B, k * k), jnp.float32),
        grid_spec=pltpu.PrefetchScalarGridSpec(
            num_scalar_prefetch=0,
            grid=(1,),
            in_specs=[full1(g), full1(fw1), full1(fb1), full1(fw2), full1(fb2),
                      full1(fw3), full1(fb3)],
            out_specs=pl.BlockSpec((B, k * k), lambda i: (0, 0)),
        ),
        compiler_params=pltpu.CompilerParams(
            dimension_semantics=("arbitrary",),
        ),
    )(g, fw1, fb1, fw2, fb2, fw3, fb3)

    return out.reshape(B, k, k)


# ---------------------------------------------------------------------------
# Parameter prep (BN scale folded into weights, shift into bias).
# ---------------------------------------------------------------------------
def _fold_bn(w_oc_ic, bias, gamma, beta, mean, var, eps=1e-5):
    """Return (W' = W^T * scale  shape (in, out), shift (1, out)) such that
    bn(x @ W^T + b) == x @ W' + shift   (eval-mode BN)."""
    scale = gamma / jnp.sqrt(var + eps)
    shift = beta + (bias - mean) * scale
    return w_oc_ic.T * scale[None, :], shift[None, :]


def make_params(key, k):
    """Deterministic synthetic parameters matching STNkd(k).__init__ shapes."""
    dims_conv = [(k, 64), (64, 128), (128, 1024)]
    dims_fc = [(1024, 512), (512, 256), (256, k * k)]
    keys = jax.random.split(key, 32)
    ki = iter(range(32))

    raw = {}
    for name, (cin, cout) in zip(["c1", "c2", "c3"], dims_conv):
        raw[name + "_w"] = jax.random.normal(keys[next(ki)], (cout, cin), jnp.float32) * 0.05
        raw[name + "_b"] = jax.random.normal(keys[next(ki)], (cout,), jnp.float32) * 0.05
        raw[name + "_g"] = jax.random.uniform(keys[next(ki)], (cout,), jnp.float32, 0.5, 1.5)
        raw[name + "_be"] = jax.random.normal(keys[next(ki)], (cout,), jnp.float32) * 0.05
        raw[name + "_m"] = jax.random.normal(keys[next(ki)], (cout,), jnp.float32) * 0.05
        raw[name + "_v"] = jax.random.uniform(keys[next(ki)], (cout,), jnp.float32, 0.5, 1.5)
    for name, (cin, cout) in zip(["f1", "f2"], dims_fc[:2]):
        raw[name + "_w"] = jax.random.normal(keys[next(ki)], (cout, cin), jnp.float32) * 0.05
        raw[name + "_b"] = jax.random.normal(keys[next(ki)], (cout,), jnp.float32) * 0.05
        raw[name + "_g"] = jax.random.uniform(keys[next(ki)], (cout,), jnp.float32, 0.5, 1.5)
        raw[name + "_be"] = jax.random.normal(keys[next(ki)], (cout,), jnp.float32) * 0.05
        raw[name + "_m"] = jax.random.normal(keys[next(ki)], (cout,), jnp.float32) * 0.05
        raw[name + "_v"] = jax.random.uniform(keys[next(ki)], (cout,), jnp.float32, 0.5, 1.5)
    raw["f3_w"] = jax.random.normal(keys[next(ki)], (k * k, 256), jnp.float32) * 0.05
    raw["f3_b"] = jax.random.normal(keys[next(ki)], (k * k,), jnp.float32) * 0.05

    folded = []
    for name in ["c1", "c2", "c3", "f1", "f2"]:
        folded.extend(_fold_bn(raw[name + "_w"], raw[name + "_b"], raw[name + "_g"],
                               raw[name + "_be"], raw[name + "_m"], raw[name + "_v"]))
    folded.append(raw["f3_w"].T)
    # Fold the flattened identity add into fc3's bias (free at kernel time).
    iden = jnp.eye(k, dtype=jnp.float32).reshape(1, k * k)
    folded.append(raw["f3_b"][None, :] + iden)
    return tuple(folded), raw


def reference_forward(x_bkn, raw, k, eps=1e-5):
    """Pure-JAX reference with unfused eval-mode BatchNorm (for checking)."""
    def bn(h, name):
        return (h - raw[name + "_m"]) / jnp.sqrt(raw[name + "_v"] + eps) * raw[name + "_g"] + raw[name + "_be"]

    x = jnp.transpose(x_bkn, (0, 2, 1))  # (B, N, k)
    h = jax.nn.relu(bn(x @ raw["c1_w"].T + raw["c1_b"], "c1"))
    h = jax.nn.relu(bn(h @ raw["c2_w"].T + raw["c2_b"], "c2"))
    h = jax.nn.relu(bn(h @ raw["c3_w"].T + raw["c3_b"], "c3"))
    g = jnp.max(h, axis=1)  # (B, 1024)
    f = jax.nn.relu(bn(g @ raw["f1_w"].T + raw["f1_b"], "f1"))
    f = jax.nn.relu(bn(f @ raw["f2_w"].T + raw["f2_b"], "f2"))
    f = f @ raw["f3_w"].T + raw["f3_b"]
    f = f + jnp.eye(k, dtype=jnp.float32).reshape(1, k * k)
    return f.reshape(-1, k, k)


if __name__ == "__main__":
    B, K, N = 2, 16, 40  # small: batch=2, k=16 features, 40 points
    key = jax.random.PRNGKey(0)
    kx, kp = jax.random.split(key)
    x = jax.random.normal(kx, (B, K, N), jnp.float32)  # PyTorch NCW input

    params, raw = make_params(kp, K)

    # tile_n=16 -> 3 point tiles per batch element (exercises the running-max
    # accumulator and last-tile padding mask). Default tile_n=512 for real N.
    out = stnkd_forward(x, params, tile_n=16)
    out = jax.block_until_ready(out)
    assert out.shape == (B, K, K), out.shape

    ref = reference_forward(x, raw, K)
    err = float(jnp.max(jnp.abs(out - ref)))
    assert jnp.allclose(out, ref, atol=1e-4, rtol=1e-4), err

    print("KERNEL_OK")
</pallas_src>

<mosaic_0001>
module attributes {stable_mosaic.version = 11 : i64} {
  func.func @_conv_pool_kernel(%arg0: i32, %arg1: i32, %arg2: memref<1x16x16xf32, #tpu.memory_space<vmem>>, %arg3: memref<16x64xf32, #tpu.memory_space<vmem>>, %arg4: memref<1x64xf32, #tpu.memory_space<vmem>>, %arg5: memref<64x128xf32, #tpu.memory_space<vmem>>, %arg6: memref<1x128xf32, #tpu.memory_space<vmem>>, %arg7: memref<128x1024xf32, #tpu.memory_space<vmem>>, %arg8: memref<1x1024xf32, #tpu.memory_space<vmem>>, %arg9: memref<1x1x1024xf32, #tpu.memory_space<vmem>>) attributes {dimension_semantics = [#tpu.dimension_semantics<parallel>, #tpu.dimension_semantics<arbitrary>], iteration_bounds = array<i64: 2, 3>, scalar_prefetch = 0 : i64, scratch_operands = 0 : i64, tpu.core_type = #tpu.core_type<tc>, window_params = [{transform_indices = @transform_0, window_bounds = array<i64: 1, 16, 16>}, {pipeline_mode = #tpu.pipeline_mode<synchronous>, transform_indices = @transform_1, window_bounds = array<i64: 16, 64>}, {pipeline_mode = #tpu.pipeline_mode<synchronous>, transform_indices = @transform_2, window_bounds = array<i64: 1, 64>}, {pipeline_mode = #tpu.pipeline_mode<synchronous>, transform_indices = @transform_3, window_bounds = array<i64: 64, 128>}, {pipeline_mode = #tpu.pipeline_mode<synchronous>, transform_indices = @transform_4, window_bounds = array<i64: 1, 128>}, {pipeline_mode = #tpu.pipeline_mode<synchronous>, transform_indices = @transform_5, window_bounds = array<i64: 128, 1024>}, {pipeline_mode = #tpu.pipeline_mode<synchronous>, transform_indices = @transform_6, window_bounds = array<i64: 1, 1024>}, {transform_indices = @transform_7, window_bounds = array<i64: 1, 1, 1024>}]} {
    %c0_i32 = arith.constant 0 : i32
    %0 = arith.cmpi eq, %arg1, %c0_i32 : i32
    %1 = arith.extui %0 : i1 to i32
    %c0_i32_0 = arith.constant 0 : i32
    %2 = arith.cmpi ne, %1, %c0_i32_0 : i32
    scf.if %2 {
      %cst_28 = arith.constant 0xFF800000 : f32
      %44 = vector.broadcast %cst_28 : f32 to vector<1x1x1024xf32>
      %c0_29 = arith.constant 0 : index
      %c0_30 = arith.constant 0 : index
      %c0_31 = arith.constant 0 : index
      %45 = vector.load %arg9[%c0_29, %c0_30, %c0_31] : memref<1x1x1024xf32, #tpu.memory_space<vmem>>, vector<1x1x1024xf32>
      tpu.vector_store %arg9[%c0_29, %c0_30, %c0_31], %44 {strides = array<i32>} : memref<1x1x1024xf32, #tpu.memory_space<vmem>>, vector<1x1x1024xf32>,
    } else {
    }
    %c0 = arith.constant 0 : index
    %c0_1 = arith.constant 0 : index
    %c0_2 = arith.constant 0 : index
    %3 = vector.load %arg2[%c0, %c0_1, %c0_2] : memref<1x16x16xf32, #tpu.memory_space<vmem>>, vector<1x16x16xf32>
    %4 = vector.shape_cast %3 : vector<1x16x16xf32> to vector<16x16xf32>
    %c0_3 = arith.constant 0 : index
    %c0_4 = arith.constant 0 : index
    %5 = vector.load %arg3[%c0_3, %c0_4] : memref<16x64xf32, #tpu.memory_space<vmem>>, vector<16x64xf32>
    %cst = arith.constant dense<0.000000e+00> : vector<16x64xf32>
    %6 = tpu.matmul %4, %5, %cst {dimension_numbers = #tpu.dot_dimension_numbers<[1], [0], [0], [1], [0, 0, 1, 1], [], []>} : vector<16x16xf32>, vector<16x64xf32>, vector<16x64xf32> -> vector<16x64xf32>
    %c0_5 = arith.constant 0 : index
    %c0_6 = arith.constant 0 : index
    %7 = vector.load %arg4[%c0_5, %c0_6] : memref<1x64xf32, #tpu.memory_space<vmem>>, vector<1x64xf32>
    %8 = vector.broadcast %7 : vector<1x64xf32> to vector<16x64xf32>
    %9 = arith.addf %6, %8 : vector<16x64xf32>
    %cst_7 = arith.constant 0.000000e+00 : f32
    %10 = vector.broadcast %cst_7 : f32 to vector<16x64xf32>
    %11 = arith.maximumf %9, %10 : vector<16x64xf32>
    %c0_8 = arith.constant 0 : index
    %c0_9 = arith.constant 0 : index
    %12 = vector.load %arg5[%c0_8, %c0_9] : memref<64x128xf32, #tpu.memory_space<vmem>>, vector<64x128xf32>
    %cst_10 = arith.constant dense<0.000000e+00> : vector<16x128xf32>
    %13 = tpu.matmul %11, %12, %cst_10 {dimension_numbers = #tpu.dot_dimension_numbers<[1], [0], [0], [1], [0, 0, 1, 1], [], []>} : vector<16x64xf32>, vector<64x128xf32>, vector<16x128xf32> -> vector<16x128xf32>
    %c0_11 = arith.constant 0 : index
    %c0_12 = arith.constant 0 : index
    %14 = vector.load %arg6[%c0_11, %c0_12] : memref<1x128xf32, #tpu.memory_space<vmem>>, vector<1x128xf32>
    %15 = vector.broadcast %14 : vector<1x128xf32> to vector<16x128xf32>
    %16 = arith.addf %13, %15 : vector<16x128xf32>
    %cst_13 = arith.constant 0.000000e+00 : f32
    %17 = vector.broadcast %cst_13 : f32 to vector<16x128xf32>
    %18 = arith.maximumf %16, %17 : vector<16x128xf32>
    %c0_14 = arith.constant 0 : index
    %c0_15 = arith.constant 0 : index
    %19 = vector.load %arg7[%c0_14, %c0_15] : memref<128x1024xf32, #tpu.memory_space<vmem>>, vector<128x1024xf32>
    %cst_16 = arith.constant dense<0.000000e+00> : vector<16x1024xf32>
    %20 = tpu.matmul %18, %19, %cst_16 {dimension_numbers = #tpu.dot_dimension_numbers<[1], [0], [0], [1], [0, 0, 1, 1], [], []>} : vector<16x128xf32>, vector<128x1024xf32>, vector<16x1024xf32> -> vector<16x1024xf32>
    %c0_17 = arith.constant 0 : index
    %c0_18 = arith.constant 0 : index
    %21 = vector.load %arg8[%c0_17, %c0_18] : memref<1x1024xf32, #tpu.memory_space<vmem>>, vector<1x1024xf32>
    %22 = vector.broadcast %21 : vector<1x1024xf32> to vector<16x1024xf32>
    %23 = arith.addf %20, %22 : vector<16x1024xf32>
    %cst_19 = arith.constant 0.000000e+00 : f32
    %24 = vector.broadcast %cst_19 : f32 to vector<16x1024xf32>
    %25 = arith.maximumf %23, %24 : vector<16x1024xf32>
    %c16_i32 = arith.constant 16 : i32
    %26 = arith.muli %arg1, %c16_i32 : i32
    %27 = tpu.iota {dimensions = array<i32: 0>} : vector<16x1xi32>
    %28 = vector.broadcast %26 : i32 to vector<16x1xi32>
    %29 = arith.addi %28, %27 : vector<16x1xi32>
    %c40_i32 = arith.constant 40 : i32
    %30 = vector.broadcast %c40_i32 : i32 to vector<16x1xi32>
    %31 = arith.cmpi slt, %29, %30 : vector<16x1xi32>
    %cst_20 = arith.constant 0xFF800000 : f32
    %32 = vector.shape_cast %31 : vector<16x1xi1> to vector<16x1xi1>
    %33 = vector.broadcast %32 : vector<16x1xi1> to vector<16x1024xi1>
    %34 = vector.broadcast %cst_20 : f32 to vector<16x1024xf32>
    %35 = arith.select %33, %25, %34 : vector<16x1024xi1>, vector<16x1024xf32>
    %c0_21 = arith.constant 0 : index
    %c0_22 = arith.constant 0 : index
    %c0_23 = arith.constant 0 : index
    %36 = vector.load %arg9[%c0_21, %c0_22, %c0_23] : memref<1x1x1024xf32, #tpu.memory_space<vmem>>, vector<1x1x1024xf32>
    %37 = vector.shape_cast %36 : vector<1x1x1024xf32> to vector<1x1024xf32>
    %cst_24 = arith.constant dense<0xFF800000> : vector<1024xf32>
    %38 = vector.multi_reduction <maximumf>, %35, %cst_24 [0] : vector<16x1024xf32> to vector<1024xf32>
    %39 = vector.shape_cast %38 : vector<1024xf32> to vector<1x1024xf32>
    %40 = arith.maximumf %37, %39 : vector<1x1024xf32>
    %c0_25 = arith.constant 0 : index
    %c0_26 = arith.constant 0 : index
    %c0_27 = arith.constant 0 : index
    %41 = vector.load %arg9[%c0_25, %c0_26, %c0_27] : memref<1x1x1024xf32, #tpu.memory_space<vmem>>, vector<1x1x1024xf32>
    %42 = vector.shape_cast %41 : vector<1x1x1024xf32> to vector<1x1024xf32>
    %43 = vector.shape_cast %40 : vector<1x1024xf32> to vector<1x1x1024xf32>
    tpu.vector_store %arg9[%c0_25, %c0_26, %c0_27], %43 {strides = array<i32>} : memref<1x1x1024xf32, #tpu.memory_space<vmem>>, vector<1x1x1024xf32>,
    return
  }
  func.func @transform_0(%arg0: i32, %arg1: i32) -> (i32, i32, i32) {
    %c0_i32 = arith.constant 0 : i32
    %c0_i32_0 = arith.constant 0 : i32
    return %arg0, %arg1, %c0_i32 : i32, i32, i32
  }
  func.func @transform_1(%arg0: i32, %arg1: i32) -> (i32, i32) {
    %c0_i32 = arith.constant 0 : i32
    %c0_i32_0 = arith.constant 0 : i32
    %c0_i32_1 = arith.constant 0 : i32
    return %c0_i32, %c0_i32_0 : i32, i32
  }
  func.func @transform_2(%arg0: i32, %arg1: i32) -> (i32, i32) {
    %c0_i32 = arith.constant 0 : i32
    %c0_i32_0 = arith.constant 0 : i32
    %c0_i32_1 = arith.constant 0 : i32
    return %c0_i32, %c0_i32_0 : i32, i32
  }
  func.func @transform_3(%arg0: i32, %arg1: i32) -> (i32, i32) {
    %c0_i32 = arith.constant 0 : i32
    %c0_i32_0 = arith.constant 0 : i32
    %c0_i32_1 = arith.constant 0 : i32
    return %c0_i32, %c0_i32_0 : i32, i32
  }
  func.func @transform_4(%arg0: i32, %arg1: i32) -> (i32, i32) {
    %c0_i32 = arith.constant 0 : i32
    %c0_i32_0 = arith.constant 0 : i32
    %c0_i32_1 = arith.constant 0 : i32
    return %c0_i32, %c0_i32_0 : i32, i32
  }
  func.func @transform_5(%arg0: i32, %arg1: i32) -> (i32, i32) {
    %c0_i32 = arith.constant 0 : i32
    %c0_i32_0 = arith.constant 0 : i32
    %c0_i32_1 = arith.constant 0 : i32
    return %c0_i32, %c0_i32_0 : i32, i32
  }
  func.func @transform_6(%arg0: i32, %arg1: i32) -> (i32, i32) {
    %c0_i32 = arith.constant 0 : i32
    %c0_i32_0 = arith.constant 0 : i32
    %c0_i32_1 = arith.constant 0 : i32
    return %c0_i32, %c0_i32_0 : i32, i32
  }
  func.func @transform_7(%arg0: i32, %arg1: i32) -> (i32, i32, i32) {
    %c0_i32 = arith.constant 0 : i32
    %c0_i32_0 = arith.constant 0 : i32
    %c0_i32_1 = arith.constant 0 : i32
    return %arg0, %c0_i32, %c0_i32_0 : i32, i32, i32
  }
}

</mosaic_0001>

<bundles_post_ra>
// kernel: tpu_custom_call.1
= control target key start
LH: loop header
LB: loop body
LE: loop exit
PB: predicated region body
PF: predicated region fallthrough
CT: control target
= control target key end

     0   :  { %12 = vsyncpa [#allocation3], 0  ;;  %s2059_s0 = inlined_call_operand.vmem [shape: f32[2,48,16], index: 0, kind: input, shape index: {}]   ;;  %s2060_s1 = inlined_call_operand.vmem [shape: f32[16,64], index: 1, kind: input, shape index: {}]   ;;  %s2061_s2 = inlined_call_operand.vmem [shape: f32[1,64], index: 2, kind: input, shape index: {}]   ;;  %s2062_s3 = inlined_call_operand.vmem [shape: f32[64,128], index: 3, kind: input, shape index: {}]   ;;  %s2063_s4 = inlined_call_operand.vmem [shape: f32[1,128], index: 4, kind: input, shape index: {}]   ;;  %s2064_s5 = inlined_call_operand.hbm [shape: f32[128,1024], index: 5, kind: input, shape index: {}]   ;;  %s2065_s6 = inlined_call_operand.vmem [shape: f32[1,1024], index: 6, kind: input, shape index: {}]   ;;  %s2066_s7 = inlined_call_operand.hbm [shape: f32[2,1,1024], index: 7, kind: output, shape index: {}]  }
   0x1   :  { %13 = vsyncpa [#allocation4], 0 }
   0x2   :  { %15 = vsyncpa [#allocation4 + $0x1], 0  ;;  %s1737_s24 = smov 0   ;;  %s1739_s25 = smov 0  }
   0x3   :  { %s1741_s26 = smov 0   ;;  %s1743_s27 = smov 0  }
   0x4   :  { %s1745_s28 = smov 0   ;;  %s1747_s29 = smov 0  }
   0x5   :  { %s1749_s30 = smov 0   ;;  %s1751_s8 = smov 0  }
   0x6 LB: > { %s1262_s9 = sadd.s32 4294967295, %s1688_s8   ;;  %s1263_s10 = sadd.s32 4294967294, %s1688_s8   ;;  %s1688_s8 = sphi %s1751_s8, %s21_s8   ;;  %s1684_s30 = sphi %s1749_s30, %s2093_s30   ;;  %s1680_s29 = sphi %s1747_s29, %s2092_s29   ;;  %s1676_s28 = sphi %s1745_s28, %s2091_s28   ;;  %s1672_s27 = sphi %s1743_s27, %s2090_s27   ;;  %s1668_s26 = sphi %s1741_s26, %s2089_s26   ;;  %s1664_s25 = sphi %s1739_s25, %s2088_s25   ;;  %s1660_s24 = sphi %s1737_s24, %s2087_s24  }
   0x7   : > { %s30_s11 = sadd.s32 1, %s1680_s29  ;;  %s33_s12 = sadd.s32 1, %s1684_s30 }
   0x8   : > { %p31_p0 = scmp.ge.s32.totalorder %s30_s11, 3  ;;  %s194_s13 = sadd.s32 1, %s1668_s26 }
   0x9   : > { %p204_p1 = scmp.ne.s32.totalorder %s1668_s26, %s1664_s25  ;;  %p205_p2 = scmp.eq.s32.totalorder %s1262_s9, 5 }
   0xa   : > { %s2095_s11 = smov (%p31_p0, %s30_s11), 0  ;;  %s2097_s12 = smov (!%p31_p0, %s33_s12), %s1684_s30 }
   0xb   : > { %2073 = sst [smem:[#allocation8_spill]] %s2095_s11  ;;  %p1787_p3 = por %p205_p2, %p204_p1 }
   0xc   : > { %p210_p4 = scmp.ne.s32.totalorder %s1664_s25, %s1660_s24  ;;  %p35_p5 = scmp.ge.s32.totalorder %s2097_s12, 2 }
   0xd   : > { %s2074_s14 = scalar_select %p1787_p3, 1, 0 }
   0xe   : > { %p211_p6 = scmp.eq.s32.totalorder %s1263_s10, 5  ;;  %p1264_p7 = scmp.ge.s32.totalorder %s1688_s8, 1 }
   0xf   : > { %p218_p8 = scmp.lt.s32.totalorder %s1688_s8, 7  ;;  %s2099_s12 = smov (%p35_p5, %s2097_s12), 0 }
  0x10   : > { %2075 = sst [smem:[#allocation9_spill]] %s2099_s12  ;;  %p1797_p9 = por %p211_p6, %p210_p4 }
  0x11   : > { %p1801_p10 = pnand %p1264_p7, %p218_p8  ;;  %s191_s17 = ssub.s32 %s1684_s30, %s2099_s12 }
  0x12   : > { %s2076_s15 = scalar_select %p1797_p9, 1, 0 }
  0x13   : > { %s2077_s16 = scalar_select %p1801_p10, 1, 0 }
  0x14   : > { %p192_p11 = scmp.eq.s32.totalorder %s191_s17, 0  ;;  %p1481_p12 = pneg %p1801_p10 }
  0x15   : > { %p1809_p13 = scmp.eq.s32.totalorder %s1262_s9, 0  ;;  %s1690_s20 = smov [#allocation2]  }
  0x16   : > { %s1814_s19 = scalar_select %p192_p11, %s1668_s26, %s194_s13  }
  0x17   : > { %s2078_s18 = scalar_select %p1809_p13, 1, 0 }
  0x18   : > { %s242_s21 = sshll.u32 %s1690_s20, 4  ;;  %p1818_p0 = pnand %p1809_p13, %p1481_p12  ;;  %s243_s21 = int_to_ptr.vmem [resolvable:$true] %s242_s21 }
  0x19   : > { %s1562_s17 = scalar_lea.hbm %s2064_s5, 16384 }
  0x1a   : > { %p1563_p1 = scmp.ne.s32.totalorder %s2064_s5, %s1562_s17  ;;  %p1564_p2 = pneg %p1818_p0 }
  0x1b   : > { %p1569_p6 = scmp.lt.u32.totalorder %s1562_s17, %s2064_s5 }
  0x1c   : > { %p1565_p4 = pnand %p1564_p2, %p1563_p1 }
  0x1e   : > { %p1566_p5 = pneg %p1565_p4 }
  0x20   : > { %p1571_p7 = pnand %p1569_p6, %p1566_p5 }
  0x22   : > { %1574 = shalt.err (!%p1571_p7)
}
  0x23   : > { %s1575_s11 = scalar_lea.vmem %s243_s21, 16384  ;;  %p1583_p9 = scmp.lt.s32.totalorder %s243_s21, %s243_s21 }
  0x24   : > { %p1576_p8 = scmp.ne.s32.totalorder %s243_s21, %s1575_s11  ;;  %p1584_p3 = scmp.lt.s32.totalorder %s1575_s11, %s1575_s11 }
  0x26   : > { %p1578_p11 = pnand %p1576_p8, %p1564_p2  ;;  %p1585_p13 = por %p1584_p3, %p1583_p9 }
  0x28   : > { %p1579_p12 = pneg %p1578_p11 }
  0x2a   : > { %p1586_p10 = pnand %p1585_p13, %p1579_p12 }
  0x2c   : > { %1589 = shalt.err (!%p1586_p10)
}
  0x2d   : > { %s1691_s12 = smov 1024   ;;  %s1692_s23 = smov 64  }
  0x2e   : > { %1484 = dma.hbm_to_vmem [thread:$0]  (!%p1818_p0), %s2064_s5, 16384, %s243_s21, [#allocation3], %s1691_s12, %s1691_s12, %s1692_s23  }
  0x2f   : > { %p2080_p1 = scmp.ne.s32.totalorder %s2077_s16, 0 }
  0x30   : > { %p2081_p4 = scmp.ne.s32.totalorder (!%p2080_p1), %s2078_s18, 0 }
  0x31   : > { %274 = sbr.rel (%p2080_p1) target bundleno = 806 (0x326), region = 48 }
  0x38   : > { %1651 = dma.done.wait (%p2081_p4), [#allocation3], 16384  }
  0x39   : > { %1653 = vsyncadd (%p2081_p4), [#allocation3], 4294950912  ;;  %s2072_s11 = sand.u32 1, %s1664_s25   ;;  %s1270_s22 = sshll.u32 %s1672_s27, 1 }
  0x3a   : > { %s1269_s17 = sshll.u32 %s2072_s11, 3  ;;  %p311_p3 = scmp.lt.s32.totalorder %s1676_s28, 1 }
  0x3b   : > { %p313_p9 = scmp.lt.s32.totalorder %s1270_s22, 5  ;;  %s1853_s10 = scalar_lea.vmem [#allocation5], %s1269_s17 }
  0x3c   : > { %s312_s21 = scalar_select %p311_p3, %s1676_s28, 1 }
  0x3d   : > { %s2101_s22 = smov (!%p313_p9, %s1270_s22), 5  ;;  %p1272_p10 = scmp.ne.s32.totalorder %s1672_s27, 0 }
  0x3e   : > { %s1474_s16 = smul.u32 6, %s312_s21  ;;  %v1693_v0 = vmov (!%p1272_p10), -inf  }
  0x3f   : > { %323 = sbr.rel (%p1272_p10) target bundleno = 70 (0x46), region = 56  ;;  %324 = vst [vmem:[%s1853_s10] sm:$0xff] (!%p1272_p10), %v1693_v0 }
  0x40   : > { %s316_s13 = sadd.s32 %s1474_s16, %s2101_s22 }
  0x41   : > { %s1271_s20 = sshll.u32 %s316_s13, 3 }
  0x42   : > { %s318_s18 = scalar_lea.vmem %s2059_s0, %s1271_s20 }
  0x46 PF: > { %v327_v1 = vld [vmem:[%s2060_s1] sm:$0xff]  ;;  %v328_v2 = vld [vmem:[%s2060_s1 + $0x8] sm:$0xff]  ;;  %vm336_vm0 = vcmask 130048   ;;  %v422_v8 = vld [vmem:[%s2062_s3 + $0x10] sm:$0xff]  ;;  %vm435_vm1 = vcmask 523264   ;;  %s1279_s16 = sshll.u32 %s1672_s27, 4 }
  0x47   : > { %v325_v3 = vld [vmem:[%s318_s18] sm:$0xff]  ;;  %v1326_v4 = vpack.c.bf16 %v328_v2, %v327_v1  ;;  %v421_v6 = vld [vmem:[%s2062_s3 + $0x8] sm:$0xff]  ;;  %v423_v9 = vld [vmem:[%s2062_s3 + $0x18] sm:$0xff]  ;;  %s1285_s27 = sshll.u32 %s1676_s28, 7  ;;  %s1174_s13 = sshll.u32 %s1853_s10, 4  ;;  %s2005_s13 = int_to_ptr.vmem [resolvable:$true] %s1174_s13 }
  0x48   : > { %1304 = vmatprep.mubr.msk.f32.mxu0 %vm336_vm0, %v325_v3  ;;  %v420_v5 = vld [vmem:[%s2062_s3] sm:$0xff]  ;;  %v1334_v10 = vpack.c.bf16 %v423_v9, %v422_v8  ;;  %v425_v12 = vld [vmem:[%s2062_s3 + $0x28] sm:$0xff]  ;;  %v426_v15 = vld [vmem:[%s2062_s3 + $0x30] sm:$0xff]  ;;  %s2003_s12 = scalar_lea.hbm %s2066_s7, %s1285_s27  ;;  %s1590_s9 = scalar_lea.vmem %s2005_s13, 128 }
  0x49   : > { %v1330_v7 = vpack.c.bf16 %v421_v6, %v420_v5  ;;  %1327 = vmatprep.subr.bf16.mxu0 %v1326_v4  ;;  %v424_v11 = vld [vmem:[%s2062_s3 + $0x20] sm:$0xff]  ;;  %v326_v13 = vld [vmem:[%s318_s18 + $0x8] sm:$0xff]  ;;  %v427_v16 = vld [vmem:[%s2062_s3 + $0x38] sm:$0xff]  ;;  %s2082_s18 = sand.u32 1, %s1664_s25   ;;  %p1591_p13 = scmp.ne.s32.totalorder %s2005_s13, %s1590_s9 }
  0x4a   : > { %1329 = vmatpush3.bf16.msra.mxu0 %v1326_v4  ;;  %v1338_v14 = vpack.c.bf16 %v425_v12, %v424_v11  ;;  %v1342_v17 = vpack.c.bf16 %v427_v16, %v426_v15  ;;  %v520_v18 = vld [vmem:[#allocation2 + $0x8] sm:$0xff]  ;;  %v522_v20 = vld [vmem:[#allocation2 + $0x18] sm:$0xff]  ;;  %v519_v23 = vld [vmem:[#allocation2] sm:$0xff]  ;;  %s1160_s23 = scalar_lea.sflag [#allocation4], %s2082_s18  ;;  %p2083_p0 = scmp.ne.s32.totalorder %s2074_s14, 0 }
  0x4b   : > { %1331 = vmatprep.subr.bf16.mxu1 %v1330_v7  ;;  %v528_v19 = vld [vmem:[#allocation2 + $0x48] sm:$0xff]  ;;  %v530_v22 = vld [vmem:[#allocation2 + $0x58] sm:$0xff]  ;;  %v527_v24 = vld [vmem:[#allocation2 + $0x40] sm:$0xff]  ;;  %s1696_s28 = smov [#allocation5]  }
  0x4c   : > { %1333 = vmatpush3.bf16.msra.mxu1 %v1330_v7  ;;  %v1346_v21 = vpack.c.bf16 %v528_v19, %v520_v18  ;;  %v1378_v25 = vpack.c.bf16 %v530_v22, %v522_v20  ;;  %v1348_v26 = vpack.c.bf16 %v527_v24, %v519_v23  ;;  %v536_v27 = vld [vmem:[#allocation2 + $0x88] sm:$0xff]  ;;  %v535_v30 = vld [vmem:[#allocation2 + $0x80] sm:$0xff]  ;;  %v521_v3 = vld [vmem:[#allocation2 + $0x10] sm:$0xff]  ;;  %p1592_p2 = pnand %p1591_p13, %p2083_p0  ;;  %s1594_s21 = sshll.u32 %s1696_s28, 4  ;;  %s1595_s21 = int_to_ptr.vmem [resolvable:$false] %s1594_s21 }
  0x4d   : > { %1335 = vmatprep.subr.bf16.mxu1 %v1334_v10  ;;  %1305 = vmatmul.mubr.msk.f32.vlgmr.msra.gmra.mrb[0].mxu0 %vm336_vm0, %v326_v13  ;;  %v544_v28 = vld [vmem:[#allocation2 + $0xc8] sm:$0xff]  ;;  %v543_v31 = vld [vmem:[#allocation2 + $0xc0] sm:$0xff]  ;;  %v529_v4 = vld [vmem:[#allocation2 + $0x50] sm:$0xff]  ;;  %s1596_s22 = scalar_lea.vmem %s1595_s21, 256  ;;  %p1597_p6 = scmp.lt.s32.totalorder %s2005_s13, %s1595_s21 }
  0x4e   : > { %1347 = vmatprep.subr.bf16.mxu0 %v1346_v21  ;;  %v1350_v29 = vpack.c.bf16 %v544_v28, %v536_v27  ;;  %v1352_v32 = vpack.c.bf16 %v543_v31, %v535_v30  ;;  %v552_v33 = vld [vmem:[#allocation2 + $0x108] sm:$0xff]  ;;  %v551_v36 = vld [vmem:[#allocation2 + $0x100] sm:$0xff]  ;;  %v538_v6 = vld [vmem:[#allocation2 + $0x98] sm:$0xff]  ;;  %v1380_v9 = vpack.c.bf16 %v529_v4, %v521_v3  ;;  %p1593_p5 = pneg %p1592_p2  ;;  %p1598_p7 = scmp.lt.s32.totalorder %s1596_s22, %s1590_s9 }
  0x4f   : > { %1349 = vmatpush1.bf16.msra.mxu0 %v1348_v26  ;;  %v560_v34 = vld [vmem:[#allocation2 + $0x148] sm:$0xff]  ;;  %v559_v37 = vld [vmem:[#allocation2 + $0x140] sm:$0xff]  ;;  %v546_v7 = vld [vmem:[#allocation2 + $0xd8] sm:$0xff] }
  0x50   : > { %1337 = vmatpush3.bf16.msra.mxu1 %v1334_v10  ;;  %1351 = vmatprep.subr.bf16.mxu0 %v1350_v29  ;;  %v1354_v35 = vpack.c.bf16 %v560_v34, %v552_v33  ;;  %v1356_v38 = vpack.c.bf16 %v559_v37, %v551_v36  ;;  %v568_v39 = vld [vmem:[#allocation2 + $0x188] sm:$0xff]  ;;  %v567_v42 = vld [vmem:[#allocation2 + $0x180] sm:$0xff]  ;;  %v1382_v11 = vpack.c.bf16 %v546_v7, %v538_v6  ;;  %v537_v12 = vld [vmem:[#allocation2 + $0x90] sm:$0xff]  ;;  %p1599_p8 = por %p1598_p7, %p1597_p6 }
  0x51   : > { %1339 = vmatprep.subr.bf16.mxu1 %v1338_v14  ;;  %v576_v40 = vld [vmem:[#allocation2 + $0x1c8] sm:$0xff]  ;;  %v575_v43 = vld [vmem:[#allocation2 + $0x1c0] sm:$0xff]  ;;  %v545_v13 = vld [vmem:[#allocation2 + $0xd0] sm:$0xff] }
  0x52   : > { %v1358_v41 = vpack.c.bf16 %v576_v40, %v568_v39  ;;  %v1360_v44 = vpack.c.bf16 %v575_v43, %v567_v42  ;;  %v584_v45 = vld [vmem:[#allocation2 + $0x208] sm:$0xff]  ;;  %v583_v48 = vld [vmem:[#allocation2 + $0x200] sm:$0xff]  ;;  %v562_v15 = vld [vmem:[#allocation2 + $0x158] sm:$0xff]  ;;  %v1384_v16 = vpack.c.bf16 %v545_v13, %v537_v12  ;;  %p1600_p11 = pnand %p1599_p8, %p1593_p5 }
  0x53   : > { %1353 = vmatpush1.bf16.msra.mxu0 %v1352_v32  ;;  %v592_v46 = vld [vmem:[#allocation2 + $0x248] sm:$0xff]  ;;  %v591_v49 = vld [vmem:[#allocation2 + $0x240] sm:$0xff]  ;;  %v553_v18 = vld [vmem:[#allocation2 + $0x110] sm:$0xff] }
  0x54   : > { %1341 = vmatpush3.bf16.msra.mxu1 %v1338_v14  ;;  %1355 = vmatprep.subr.bf16.mxu0 %v1354_v35  ;;  %v1362_v47 = vpack.c.bf16 %v592_v46, %v584_v45  ;;  %v1364_v50 = vpack.c.bf16 %v591_v49, %v583_v48  ;;  %v600_v51 = vld [vmem:[#allocation2 + $0x288] sm:$0xff]  ;;  %v599_v54 = vld [vmem:[#allocation2 + $0x280] sm:$0xff]  ;;  %v554_v14 = vld [vmem:[#allocation2 + $0x118] sm:$0xff] }
  0x55   : > { %1343 = vmatprep.subr.bf16.mxu1 %v1342_v17  ;;  %v608_v52 = vld [vmem:[#allocation2 + $0x2c8] sm:$0xff]  ;;  %v607_v55 = vld [vmem:[#allocation2 + $0x2c0] sm:$0xff]  ;;  %v561_v19 = vld [vmem:[#allocation2 + $0x150] sm:$0xff] }
  0x56   : > { %v1366_v53 = vpack.c.bf16 %v608_v52, %v600_v51  ;;  %v1368_v56 = vpack.c.bf16 %v607_v55, %v599_v54  ;;  %v616_v57 = vld [vmem:[#allocation2 + $0x308] sm:$0xff]  ;;  %v615_v60 = vld [vmem:[#allocation2 + $0x300] sm:$0xff]  ;;  %v570_v20 = vld [vmem:[#allocation2 + $0x198] sm:$0xff]  ;;  %v1388_v22 = vpack.c.bf16 %v561_v19, %v553_v18 }
  0x57   : > { %1357 = vmatpush1.bf16.msra.mxu0 %v1356_v38  ;;  %v624_v58 = vld [vmem:[#allocation2 + $0x348] sm:$0xff]  ;;  %v623_v61 = vld [vmem:[#allocation2 + $0x340] sm:$0xff]  ;;  %v578_v21 = vld [vmem:[#allocation2 + $0x1d8] sm:$0xff] }
  0x58   : > { %1345 = vmatpush3.bf16.msra.mxu1 %v1342_v17  ;;  %1359 = vmatprep.subr.bf16.mxu0 %v1358_v41  ;;  %v1370_v59 = vpack.c.bf16 %v624_v58, %v616_v57  ;;  %v1372_v62 = vpack.c.bf16 %v623_v61, %v615_v60  ;;  %v1273_v63 = vld [vmem:[%s2061_s2] ss:$0 sm:$0xff]  ;;  %v1386_v17 = vpack.c.bf16 %v562_v15, %v554_v14  ;;  %v569_v24 = vld [vmem:[#allocation2 + $0x190] sm:$0xff]  ;;  %v586_v26 = vld [vmem:[#allocation2 + $0x218] sm:$0xff] }
  0x59   : > { %1379 = vmatprep.subr.bf16.mxu1 %v1378_v25  ;;  %v1390_v23 = vpack.c.bf16 %v578_v21, %v570_v20  ;;  %v577_v25 = vld [vmem:[#allocation2 + $0x1d0] sm:$0xff]  ;;  %v594_v27 = vld [vmem:[#allocation2 + $0x258] sm:$0xff]  ;;  %v632_v45 = vld [vmem:[#allocation2 + $0x388] sm:$0xff] }
  0x5a   : > { %v1392_v28 = vpack.c.bf16 %v577_v25, %v569_v24  ;;  %v1394_v29 = vpack.c.bf16 %v594_v27, %v586_v26  ;;  %v585_v30 = vld [vmem:[#allocation2 + $0x210] sm:$0xff]  ;;  %v602_v32 = vld [vmem:[#allocation2 + $0x298] sm:$0xff]  ;;  %v640_v46 = vld [vmem:[#allocation2 + $0x3c8] sm:$0xff] }
  0x5b   : > { %1361 = vmatpush1.bf16.msra.mxu0 %v1360_v44  ;;  %v593_v31 = vld [vmem:[#allocation2 + $0x250] sm:$0xff]  ;;  %v610_v33 = vld [vmem:[#allocation2 + $0x2d8] sm:$0xff]  ;;  %v1374_v48 = vpack.c.bf16 %v640_v46, %v632_v45  ;;  %v639_v51 = vld [vmem:[#allocation2 + $0x3c0] sm:$0xff] }
  0x5c   : > { %1363 = vmatprep.subr.bf16.mxu0 %v1362_v47  ;;  %v1396_v34 = vpack.c.bf16 %v593_v31, %v585_v30  ;;  %v1398_v35 = vpack.c.bf16 %v610_v33, %v602_v32  ;;  %v601_v36 = vld [vmem:[#allocation2 + $0x290] sm:$0xff]  ;;  %v618_v38 = vld [vmem:[#allocation2 + $0x318] sm:$0xff]  ;;  %v524_v57 = vld [vmem:[#allocation2 + $0x28] sm:$0xff] }
  0x5d   : > { %v609_v37 = vld [vmem:[#allocation2 + $0x2d0] sm:$0xff]  ;;  %v626_v39 = vld [vmem:[#allocation2 + $0x358] sm:$0xff]  ;;  %v532_v58 = vld [vmem:[#allocation2 + $0x68] sm:$0xff] }
  0x5e   : > { %v1400_v40 = vpack.c.bf16 %v609_v37, %v601_v36  ;;  %v1402_v41 = vpack.c.bf16 %v626_v39, %v618_v38  ;;  %v617_v42 = vld [vmem:[#allocation2 + $0x310] sm:$0xff]  ;;  %v634_v47 = vld [vmem:[#allocation2 + $0x398] sm:$0xff]  ;;  %v1410_v60 = vpack.c.bf16 %v532_v58, %v524_v57  ;;  %v531_v3 = vld [vmem:[#allocation2 + $0x60] sm:$0xff] }
  0x5f   : > { %1365 = vmatpush1.bf16.msra.mxu0 %v1364_v50  ;;  %v625_v43 = vld [vmem:[#allocation2 + $0x350] sm:$0xff]  ;;  %v642_v49 = vld [vmem:[#allocation2 + $0x3d8] sm:$0xff]  ;;  %v631_v50 = vld [vmem:[#allocation2 + $0x380] sm:$0xff] }
  0x60   : > { %1367 = vmatprep.subr.bf16.mxu0 %v1366_v53  ;;  %v1404_v44 = vpack.c.bf16 %v625_v43, %v617_v42  ;;  %v1406_v52 = vpack.c.bf16 %v642_v49, %v634_v47  ;;  %v1376_v53 = vpack.c.bf16 %v639_v51, %v631_v50  ;;  %v633_v54 = vld [vmem:[#allocation2 + $0x390] sm:$0xff]  ;;  %v534_v61 = vld [vmem:[#allocation2 + $0x78] sm:$0xff]  ;;  %v540_v7 = vld [vmem:[#allocation2 + $0xa8] sm:$0xff] }
  0x61   : > { %v641_v55 = vld [vmem:[#allocation2 + $0x3d0] sm:$0xff]  ;;  %v539_v14 = vld [vmem:[#allocation2 + $0xa0] sm:$0xff]  ;;  %v556_v20 = vld [vmem:[#allocation2 + $0x128] sm:$0xff] }
  0x62   : > { %v525_v4 = vld [vmem:[#allocation2 + $0x30] sm:$0xff]  ;;  %v547_v15 = vld [vmem:[#allocation2 + $0xe0] sm:$0xff]  ;;  %v558_v24 = vld [vmem:[#allocation2 + $0x138] sm:$0xff] }
  0x63   : > { %1369 = vmatpush1.bf16.msra.mxu0 %v1368_v56  ;;  %v1408_v56 = vpack.c.bf16 %v641_v55, %v633_v54  ;;  %v541_v18 = vld [vmem:[#allocation2 + $0xb0] sm:$0xff]  ;;  %v566_v25 = vld [vmem:[#allocation2 + $0x178] sm:$0xff]  ;;  %v1416_v26 = vpack.c.bf16 %v547_v15, %v539_v14  ;;  %v580_v36 = vld [vmem:[#allocation2 + $0x1e8] sm:$0xff] }
  0x64   : > { %1371 = vmatprep.subr.bf16.mxu0 %v1370_v59  ;;  %v526_v59 = vld [vmem:[#allocation2 + $0x38] sm:$0xff]  ;;  %v549_v19 = vld [vmem:[#allocation2 + $0xf0] sm:$0xff]  ;;  %v1450_v32 = vpack.c.bf16 %v566_v25, %v558_v24  ;;  %v579_v42 = vld [vmem:[#allocation2 + $0x1e0] sm:$0xff] }
  0x65   : > { %v1448_v27 = vpack.c.bf16 %v549_v19, %v541_v18  ;;  %v557_v33 = vld [vmem:[#allocation2 + $0x130] sm:$0xff]  ;;  %v574_v37 = vld [vmem:[#allocation2 + $0x1b8] sm:$0xff]  ;;  %v588_v47 = vld [vmem:[#allocation2 + $0x228] sm:$0xff] }
  0x66   : > { %v582_v38 = vld [vmem:[#allocation2 + $0x1f8] sm:$0xff]  ;;  %v573_v45 = vld [vmem:[#allocation2 + $0x1b0] sm:$0xff]  ;;  %v595_v54 = vld [vmem:[#allocation2 + $0x260] sm:$0xff] }
  0x67   : > { %1373 = vmatpush1.bf16.msra.mxu0 %v1372_v62  ;;  %v1442_v62 = vpack.c.bf16 %v534_v61, %v526_v59  ;;  %v581_v46 = vld [vmem:[#allocation2 + $0x1f0] sm:$0xff]  ;;  %v590_v49 = vld [vmem:[#allocation2 + $0x238] sm:$0xff]  ;;  %v604_v59 = vld [vmem:[#allocation2 + $0x2a8] sm:$0xff] }
  0x68   : > { %1375 = vmatprep.subr.bf16.mxu0 %v1374_v48  ;;  %v596_v48 = vld [vmem:[#allocation2 + $0x268] sm:$0xff]  ;;  %v598_v50 = vld [vmem:[#allocation2 + $0x278] sm:$0xff]  ;;  %v589_v57 = vld [vmem:[#allocation2 + $0x230] sm:$0xff] }
  0x69   : > { %v1426_v55 = vpack.c.bf16 %v596_v48, %v588_v47  ;;  %v597_v58 = vld [vmem:[#allocation2 + $0x270] sm:$0xff]  ;;  %v606_v61 = vld [vmem:[#allocation2 + $0x2b8] sm:$0xff]  ;;  %v619_v14 = vld [vmem:[#allocation2 + $0x320] sm:$0xff] }
  0x6a   : > { %v627_v15 = vld [vmem:[#allocation2 + $0x360] sm:$0xff]  ;;  %v621_v19 = vld [vmem:[#allocation2 + $0x330] sm:$0xff]  ;;  %v646_v24 = vld [vmem:[#allocation2 + $0x3f8] sm:$0xff] }
  0x6b   : > { %1377 = vmatpush1.bf16.msra.mxu0 %v1376_v53  ;;  %v587_v53 = vld [vmem:[#allocation2 + $0x220] sm:$0xff]  ;;  %v1436_v25 = vpack.c.bf16 %v627_v15, %v619_v14 }
  0x6c   : > { %1411 = vmatprep.subr.bf16.mxu0 %v1410_v60  ;;  %v612_v60 = vld [vmem:[#allocation2 + $0x2e8] sm:$0xff] }
 0x120   : > { %v1306_v0 = vpop.f32.mrb[0].mxu0 }
 0x121   : > { %v415_v1 = vadd.f32 %v1306_v0, %v1273_v63  ;;  %v409_v2 = vpop.f32.mrb[1].mxu0  ;;  %v1276_v0 = vld [vmem:[%s2063_s4] ss:$0 sm:$0xff] }
 0x122   : > { %v410_v5 = vadd.f32 %v1273_v63, %v409_v2  ;;  %v1694_v63 = vmov 0.0  }
 0x123   : > { %v419_v10 = vmax.f32 %v415_v1, 0.0  ;;  %753 = vmatprep.mubr.f32.mxu0 %v1694_v63  ;;  %v523_v1 = vld [vmem:[#allocation2 + $0x20] sm:$0xff] }
 0x124   : > { %v418_v8 = vmax.f32 %v410_v5, 0.0  ;;  %v533_v5 = vld [vmem:[#allocation2 + $0x70] sm:$0xff]  ;;  %v1412_v12 = vpack.c.bf16 %v531_v3, %v523_v1  ;;  %v1460_v1 = vpack.c.bf16 %v597_v58, %v589_v57  ;;  %v611_v3 = vld [vmem:[#allocation2 + $0x2e0] sm:$0xff] }
 0x125   : > { %v1444_v13 = vpack.c.bf16 %v533_v5, %v525_v4  ;;  %v1430_v4 = vpack.c.bf16 %v612_v60, %v604_v59 }
 0x126   : > { %1323 = vmatprep.mubr.msk.f32.mxu1 %vm435_vm1, %v418_v8 }
 0x127   : > { %1324 = vmatmul.mubr.msk.f32.vlgmr.msra.gmra.mrb[0].mxu1 %vm435_vm1, %v419_v10  ;;  %v542_v10 = vld [vmem:[#allocation2 + $0xb8] sm:$0xff] }
 0x128   : > { %1381 = vmatpush1.bf16.msra.mxu1 %v1380_v9  ;;  %830 = vmatprep.mubr.f32.mxu1 %v1694_v63  ;;  %v548_v9 = vld [vmem:[#allocation2 + $0xe8] sm:$0xff] }
 0x129   : > { %1383 = vmatprep.subr.bf16.mxu1 %v1382_v11  ;;  %v550_v11 = vld [vmem:[#allocation2 + $0xf8] sm:$0xff]  ;;  %v1414_v21 = vpack.c.bf16 %v548_v9, %v540_v7  ;;  %v613_v7 = vld [vmem:[#allocation2 + $0x2f0] sm:$0xff]  ;;  %v628_v9 = vld [vmem:[#allocation2 + $0x368] sm:$0xff] }
 0x12c   : > { %1385 = vmatpush1.bf16.msra.mxu1 %v1384_v16 }
 0x12d   : > { %1387 = vmatprep.subr.bf16.mxu1 %v1386_v17 }
 0x130   : > { %1389 = vmatpush1.bf16.msra.mxu1 %v1388_v22  ;;  %v1446_v22 = vpack.c.bf16 %v550_v11, %v542_v10  ;;  %v622_v10 = vld [vmem:[#allocation2 + $0x338] sm:$0xff] }
 0x131   : > { %1391 = vmatprep.subr.bf16.mxu1 %v1390_v23  ;;  %v564_v23 = vld [vmem:[#allocation2 + $0x168] sm:$0xff]  ;;  %v630_v11 = vld [vmem:[#allocation2 + $0x378] sm:$0xff] }
 0x132   : > { %v1418_v31 = vpack.c.bf16 %v564_v23, %v556_v20  ;;  %v1466_v18 = vpack.c.bf16 %v630_v11, %v622_v10  ;;  %v629_v20 = vld [vmem:[#allocation2 + $0x370] sm:$0xff]  ;;  %v638_v23 = vld [vmem:[#allocation2 + $0x3b8] sm:$0xff] }
 0x134   : > { %1393 = vmatpush1.bf16.msra.mxu1 %v1392_v28  ;;  %v555_v28 = vld [vmem:[#allocation2 + $0x120] sm:$0xff] }
 0x135   : > { %1395 = vmatprep.subr.bf16.mxu1 %v1394_v29  ;;  %v563_v29 = vld [vmem:[#allocation2 + $0x160] sm:$0xff] }
 0x136   : > { %v1420_v39 = vpack.c.bf16 %v563_v29, %v555_v28  ;;  %v1470_v29 = vpack.c.bf16 %v646_v24, %v638_v23 }
 0x138   : > { %1397 = vmatpush1.bf16.msra.mxu1 %v1396_v34  ;;  %v565_v34 = vld [vmem:[#allocation2 + $0x170] sm:$0xff] }
 0x139   : > { %1399 = vmatprep.subr.bf16.mxu1 %v1398_v35  ;;  %v572_v35 = vld [vmem:[#allocation2 + $0x1a8] sm:$0xff] }
 0x13a   : > { %v1422_v43 = vpack.c.bf16 %v580_v36, %v572_v35  ;;  %v649_v36 = vlaneseq }
 0x13c   : > { %1401 = vmatpush1.bf16.msra.mxu1 %v1400_v40  ;;  %v1452_v40 = vpack.c.bf16 %v565_v34, %v557_v33  ;;  %v645_v33 = vld [vmem:[#allocation2 + $0x3f0] sm:$0xff] }
 0x13d   : > { %1403 = vmatprep.subr.bf16.mxu1 %v1402_v41  ;;  %v571_v41 = vld [vmem:[#allocation2 + $0x1a0] sm:$0xff] }
 0x13e   : > { %v1424_v51 = vpack.c.bf16 %v579_v42, %v571_v41 }
 0x140   : > { %1405 = vmatpush1.bf16.msra.mxu1 %v1404_v44  ;;  %v1454_v44 = vpack.c.bf16 %v582_v38, %v574_v37  ;;  %v1915_v37 = vshrl.u32 %v649_v36, 7 }
 0x141   : > { %1407 = vmatprep.subr.bf16.mxu1 %v1406_v52  ;;  %v1456_v52 = vpack.c.bf16 %v581_v46, %v573_v45 }
 0x142   : > { %v651_v38 = vsub.s32 0, %v1915_v37  ;;  %v1016_v45 = vadd.s32 8, %v1915_v37 }
 0x144   : > { %1409 = vmatpush1.bf16.msra.mxu1 %v1408_v56  ;;  %v1458_v56 = vpack.c.bf16 %v598_v50, %v590_v49 }
 0x145   : > { %1443 = vmatprep.subr.bf16.mxu1 %v1442_v62  ;;  %v614_v62 = vld [vmem:[#allocation2 + $0x2f8] sm:$0xff] }
 0x146   : > { %v1462_v5 = vpack.c.bf16 %v614_v62, %v606_v61 }
 0x1fa   : > { %v1325_v2 = vpop.f32.mrb[0].mxu1 }
 0x1fb   : > { %v508_v6 = vpop.f32.mrb[1].mxu1  ;;  %v514_v16 = vadd.f32 %v1325_v2, %v1276_v0  ;;  %v603_v2 = vld [vmem:[#allocation2 + $0x2a0] sm:$0xff] }
 0x1fc   : > { %v509_v8 = vadd.f32 %v1276_v0, %v508_v6  ;;  %v1428_v0 = vpack.c.bf16 %v595_v54, %v587_v53  ;;  %v605_v6 = vld [vmem:[#allocation2 + $0x2b0] sm:$0xff] }
 0x1fd   : > { %v1901_v30 = vmax.f32 %v514_v16, 0.0 }
 0x1fe   : > { %v1897_v17 = vmax.f32 %v509_v8, 0.0  ;;  %v620_v8 = vld [vmem:[#allocation2 + $0x328] sm:$0xff] }
 0x1ff   : > { %v1434_v16 = vpack.c.bf16 %v628_v9, %v620_v8 }
 0x200   : > { %754 = vmatmul.mubr.f32.vlgmr.msra.gmra.mrb[2].mxu0 %v1897_v17  ;;  %831 = vmatmul.mubr.f32.vlgmr.msra.gmra.mrb[2].mxu1 %v1897_v17 }
 0x201   : > { %1413 = vmatpush1.bf16.msra.mxu0 %v1412_v12  ;;  %1445 = vmatpush1.bf16.msra.mxu1 %v1444_v13  ;;  %v1432_v12 = vpack.c.bf16 %v611_v3, %v603_v2  ;;  %v1464_v13 = vpack.c.bf16 %v613_v7, %v605_v6 }
 0x202   : > { %759 = vmatprep.mubr.f32.mxu0 %v1694_v63  ;;  %836 = vmatprep.mubr.f32.mxu1 %v1694_v63 }
 0x203   : > { %1415 = vmatprep.subr.bf16.mxu0 %v1414_v21  ;;  %1447 = vmatprep.subr.bf16.mxu1 %v1446_v22  ;;  %v636_v21 = vld [vmem:[#allocation2 + $0x3a8] sm:$0xff] }
 0x204   : > { %760 = vmatmul.mubr.f32.gmra.mrb[4].mxu0 %v1901_v30  ;;  %837 = vmatmul.mubr.f32.gmra.mrb[4].mxu1 %v1901_v30  ;;  %v644_v22 = vld [vmem:[#allocation2 + $0x3e8] sm:$0xff] }
 0x205   : > { %1417 = vmatpush1.bf16.msra.mxu0 %v1416_v26  ;;  %1449 = vmatpush1.bf16.msra.mxu1 %v1448_v27  ;;  %v1468_v26 = vpack.c.bf16 %v629_v20, %v621_v19  ;;  %v635_v27 = vld [vmem:[#allocation2 + $0x3a0] sm:$0xff]  ;;  %v1438_v28 = vpack.c.bf16 %v644_v22, %v636_v21 }
 0x206   : > { %1419 = vmatprep.subr.bf16.mxu0 %v1418_v31  ;;  %1451 = vmatprep.subr.bf16.mxu1 %v1450_v32  ;;  %v643_v31 = vld [vmem:[#allocation2 + $0x3e0] sm:$0xff]  ;;  %v637_v32 = vld [vmem:[#allocation2 + $0x3b0] sm:$0xff] }
 0x207   : > { %907 = vmatprep.mubr.f32.mxu0 %v1694_v63  ;;  %984 = vmatprep.mubr.f32.mxu1 %v1694_v63  ;;  %v1440_v34 = vpack.c.bf16 %v643_v31, %v635_v27  ;;  %v1472_v35 = vpack.c.bf16 %v645_v33, %v637_v32  ;;  %v1695_v31 = vmov 1966171168  }
 0x208   : > { %v1112_v32 = vunpack.c.l.s4 %v1695_v31 }
 0x209   : > { %1421 = vmatpush1.bf16.msra.mxu0 %v1420_v39  ;;  %1453 = vmatpush1.bf16.msra.mxu1 %v1452_v40  ;;  %v659_v39 = vsub.s32 2, %v1915_v37  ;;  %v1922_v40 = vld [vmem:[%s2065_s6] sm:$0xff] }
 0x20a   : > { %1423 = vmatprep.subr.bf16.mxu0 %v1422_v43  ;;  %1455 = vmatprep.subr.bf16.mxu1 %v1454_v44  ;;  %v652_v41 = vrot.slane %v1922_v40, %v651_v38 }
 0x20b   : > { %v660_v42 = vrot.slane %v1922_v40, %v659_v39 }
 0x20d   : > { %1425 = vmatpush1.bf16.msra.mxu0 %v1424_v51  ;;  %1457 = vmatpush1.bf16.msra.mxu1 %v1456_v52 }
 0x20e   : > { %1427 = vmatprep.subr.bf16.mxu0 %v1426_v55  ;;  %1459 = vmatprep.subr.bf16.mxu1 %v1458_v56 }
 0x211   : > { %1429 = vmatpush1.bf16.msra.mxu0 %v1428_v0  ;;  %1461 = vmatpush1.bf16.msra.mxu1 %v1460_v1 }
 0x212   : > { %1431 = vmatprep.subr.bf16.mxu0 %v1430_v4  ;;  %1463 = vmatprep.subr.bf16.mxu1 %v1462_v5 }
 0x215   : > { %1433 = vmatpush1.bf16.msra.mxu0 %v1432_v12  ;;  %1465 = vmatpush1.bf16.msra.mxu1 %v1464_v13 }
 0x216   : > { %1435 = vmatprep.subr.bf16.mxu0 %v1434_v16  ;;  %1467 = vmatprep.subr.bf16.mxu1 %v1466_v18 }
 0x219   : > { %1437 = vmatpush1.bf16.msra.mxu0 %v1436_v25  ;;  %1469 = vmatpush1.bf16.msra.mxu1 %v1468_v26 }
 0x21a   : > { %1439 = vmatprep.subr.bf16.mxu0 %v1438_v28  ;;  %1471 = vmatprep.subr.bf16.mxu1 %v1470_v29 }
 0x21d   : > { %1441 = vmatpush1.bf16.msra.mxu0 %v1440_v34  ;;  %1473 = vmatpush1.bf16.msra.mxu1 %v1472_v35 }
 0x220   : > { %908 = vmatmul.mubr.f32.vlgmr.msra.gmra.mrb[6].mxu0 %v1897_v17  ;;  %985 = vmatmul.mubr.f32.vlgmr.msra.gmra.mrb[6].mxu1 %v1897_v17  ;;  %v655_v17 = vsub.s32 1, %v1915_v37 }
 0x221   : > { %913 = vmatprep.mubr.f32.mxu0 %v1694_v63  ;;  %990 = vmatprep.mubr.f32.mxu1 %v1694_v63  ;;  %v663_v63 = vsub.s32 3, %v1915_v37 }
 0x222   : > { %v656_v43 = vrot.slane %v1922_v40, %v655_v17 }
 0x223   : > { %v664_v44 = vrot.slane %v1922_v40, %v663_v63 }
 0x224   : > { %914 = vmatmul.mubr.f32.gmra.mrb[8].mxu0 %v1901_v30  ;;  %991 = vmatmul.mubr.f32.gmra.mrb[8].mxu1 %v1901_v30  ;;  %v1017_v30 = vstv %s1279_s16 }
 0x225   : > { %v1933_v47 = vadd.s32 %v1017_v30, %v1915_v37  ;;  %v1935_v55 = vadd.s32 %v1017_v30, %v1016_v45 }
 0x227   : > { %vm1020_vm2 = vcmp.lt.s32.totalorder %v1933_v47, 40  ;;  %vm1021_vm3 = vcmp.lt.s32.totalorder %v1935_v55, 40 }
 0x2d3   : > { %v755_v46 = vpop.f32.mrb[2].mxu0  ;;  %v832_v48 = vpop.f32.mrb[2].mxu1 }
 0x2d4   : > { %v756_v49 = vadd.f32 %v755_v46, %v652_v41  ;;  %v833_v50 = vadd.f32 %v832_v48, %v660_v42  ;;  %v757_v51 = vpop.f32.mrb[3].mxu0  ;;  %v834_v52 = vpop.f32.mrb[3].mxu1 }
 0x2d5   : > { %v758_v53 = vadd.f32 %v757_v51, %v656_v43  ;;  %v835_v54 = vadd.f32 %v834_v52, %v664_v44 }
 0x2d6   : > { %v997_v56 = vmax.f32 %v756_v49, 0.0  ;;  %v999_v57 = vmax.f32 %v833_v50, 0.0 }
 0x2d7   : > { %v761_v58 = vpop.f32.mrb[4].mxu0  ;;  %v838_v59 = vpop.f32.mrb[4].mxu1  ;;  %v998_v60 = vmax.f32 %v758_v53, 0.0  ;;  %v1000_v61 = vmax.f32 %v835_v54, 0.0  ;;  %v667_v53 = vsub.s32 4, %v1915_v37  ;;  %v675_v54 = vsub.s32 6, %v1915_v37 }
 0x2d8   : > { %v762_v62 = vadd.f32 %v761_v58, %v652_v41  ;;  %v839_v0 = vadd.f32 %v838_v59, %v660_v42  ;;  %v763_v1 = vpop.f32.mrb[5].mxu0  ;;  %v840_v2 = vpop.f32.mrb[5].mxu1  ;;  %v1026_v7 = vsel %vm1020_vm2, %v997_v56, -inf  ;;  %v1028_v8 = vsel %vm1020_vm2, %v999_v57, -inf }
 0x2d9   : > { %v764_v3 = vadd.f32 %v763_v1, %v656_v43  ;;  %v841_v4 = vadd.f32 %v840_v2, %v664_v44  ;;  %v1027_v11 = vsel %vm1020_vm2, %v998_v60, -inf  ;;  %v1029_v12 = vsel %vm1020_vm2, %v1000_v61, -inf }
 0x2da   : > { %v1005_v5 = vmax.f32 %v762_v62, 0.0  ;;  %v1007_v6 = vmax.f32 %v839_v0, 0.0  ;;  %v1113_v41 = vunpack.c.0.s8 %v1112_v32  ;;  %v671_v56 = vsub.s32 5, %v1915_v37 }
 0x2db   : > { %v1006_v9 = vmax.f32 %v764_v3, 0.0  ;;  %v1008_v10 = vmax.f32 %v841_v4, 0.0  ;;  %v679_v57 = vsub.s32 7, %v1915_v37  ;;  %v668_v60 = vrot.slane %v1922_v40, %v667_v53 }
 0x2dc   : > { %v1034_v13 = vsel %vm1021_vm3, %v1005_v5, -inf  ;;  %v1036_v14 = vsel %vm1021_vm3, %v1007_v6, -inf  ;;  %v1956_v50 = vsub.s32 %v1113_v41, %v1915_v37  ;;  %v676_v61 = vrot.slane %v1922_v40, %v675_v54 }
 0x2dd   : > { %v1043_v15 = vmax.f32 %v1026_v7, %v1034_v13  ;;  %v1057_v16 = vmax.f32 %v1028_v8, %v1036_v14  ;;  %v1035_v18 = vsel %vm1021_vm3, %v1006_v9, -inf  ;;  %v1037_v19 = vsel %vm1021_vm3, %v1008_v10, -inf }
 0x2de   : > { %v1050_v20 = vmax.f32 %v1027_v11, %v1035_v18  ;;  %v1064_v21 = vmax.f32 %v1029_v12, %v1037_v19  ;;  %v672_v0 = vrot.slane %v1922_v40, %v671_v56  ;;  %v680_v1 = vrot.slane %v1922_v40, %v679_v57 }
 0x2df   : > { %v1044_v22 = vrot.slane %v1043_v15, 4  ;;  %v1058_v23 = vrot.slane %v1057_v16, 4 }
 0x2e0   : > { %v1051_v24 = vrot.slane %v1050_v20, 4  ;;  %v1065_v25 = vrot.slane %v1064_v21, 4 }
 0x2e1   : > { %v1045_v26 = vmax.f32 %v1043_v15, %v1044_v22  ;;  %v1059_v27 = vmax.f32 %v1057_v16, %v1058_v23 }
 0x2e2   : > { %v1052_v28 = vmax.f32 %v1050_v20, %v1051_v24  ;;  %v1066_v29 = vmax.f32 %v1064_v21, %v1065_v25 }
 0x2e3   : > { %v1046_v33 = vrot.slane %v1045_v26, 2  ;;  %v1060_v34 = vrot.slane %v1059_v27, 2 }
 0x2e4   : > { %v1053_v35 = vrot.slane %v1052_v28, 2  ;;  %v1067_v36 = vrot.slane %v1066_v29, 2 }
 0x2e5   : > { %v1047_v38 = vmax.f32 %v1045_v26, %v1046_v33  ;;  %v1061_v39 = vmax.f32 %v1059_v27, %v1060_v34 }
 0x2e6   : > { %v1054_v17 = vmax.f32 %v1052_v28, %v1053_v35  ;;  %v1068_v63 = vmax.f32 %v1066_v29, %v1067_v36 }
 0x2e7   : > { %v1048_v30 = vrot.slane %v1047_v38, 1  ;;  %v1062_v42 = vrot.slane %v1061_v39, 1 }
 0x2e8   : > { %v1055_v43 = vrot.slane %v1054_v17, 1  ;;  %v1069_v44 = vrot.slane %v1068_v63, 1 }
 0x2e9   : > { %v1049_v45 = vmax.f32 %v1047_v38, %v1048_v30  ;;  %v1063_v46 = vmax.f32 %v1061_v39, %v1062_v42 }
 0x2ea   : > { %v1056_v48 = vmax.f32 %v1054_v17, %v1055_v43  ;;  %v1070_v49 = vmax.f32 %v1068_v63, %v1069_v44 }
 0x2ec   : > { %v1107_v51 = vcombine.low %v1049_v45, %v1056_v48  ;;  %v1108_v52 = vcombine.low %v1063_v46, %v1070_v49 }
 0x2ee   : > { %v1963_v58 = vrot.slane %v1107_v51, %v1956_v50  ;;  %v1966_v59 = vrot.slane %v1108_v52, %v1956_v50 }
 0x2f0   : > { %v1139_v62 = vcombine.low %v1963_v58, %v1966_v59 }
 0x2f3   : > { %v909_v2 = vpop.f32.mrb[6].mxu0  ;;  %v986_v3 = vpop.f32.mrb[6].mxu1 }
 0x2f4   : > { %v910_v37 = vadd.f32 %v909_v2, %v668_v60  ;;  %v987_v4 = vadd.f32 %v986_v3, %v676_v61  ;;  %v911_v5 = vpop.f32.mrb[7].mxu0  ;;  %v988_v6 = vpop.f32.mrb[7].mxu1 }
 0x2f5   : > { %v912_v7 = vadd.f32 %v911_v5, %v672_v0  ;;  %v989_v8 = vadd.f32 %v988_v6, %v680_v1  ;;  %v1147_v6 = vrot.slane %v1139_v62, %v1956_v50 }
 0x2f6   : > { %v1001_v9 = vmax.f32 %v910_v37, 0.0  ;;  %v1003_v10 = vmax.f32 %v987_v4, 0.0 }
 0x2f7   : > { %v915_v11 = vpop.f32.mrb[8].mxu0  ;;  %v992_v12 = vpop.f32.mrb[8].mxu1  ;;  %v1002_v13 = vmax.f32 %v912_v7, 0.0  ;;  %v1004_v14 = vmax.f32 %v989_v8, 0.0  ;;  %v1042_v8 = vld [vmem:[%s1853_s10] sm:$0xff] }
 0x2f8   : > { %v916_v15 = vadd.f32 %v915_v11, %v668_v60  ;;  %v993_v16 = vadd.f32 %v992_v12, %v676_v61  ;;  %v917_v18 = vpop.f32.mrb[9].mxu0  ;;  %v994_v19 = vpop.f32.mrb[9].mxu1  ;;  %v1030_v23 = vsel %vm1020_vm2, %v1001_v9, -inf  ;;  %v1032_v24 = vsel %vm1020_vm2, %v1003_v10, -inf }
 0x2f9   : > { %v918_v20 = vadd.f32 %v917_v18, %v672_v0  ;;  %v995_v40 = vadd.f32 %v994_v19, %v680_v1  ;;  %v1031_v27 = vsel %vm1020_vm2, %v1002_v13, -inf  ;;  %v1033_v28 = vsel %vm1020_vm2, %v1004_v14, -inf }
 0x2fa   : > { %v1009_v21 = vmax.f32 %v916_v15, 0.0  ;;  %v1011_v22 = vmax.f32 %v993_v16, 0.0 }
 0x2fb   : > { %v1010_v25 = vmax.f32 %v918_v20, 0.0  ;;  %v1012_v26 = vmax.f32 %v995_v40, 0.0 }
 0x2fc   : > { %v1038_v29 = vsel %vm1021_vm3, %v1009_v21, -inf  ;;  %v1040_v31 = vsel %vm1021_vm3, %v1011_v22, -inf }
 0x2fd   : > { %v1071_v32 = vmax.f32 %v1030_v23, %v1038_v29  ;;  %v1085_v33 = vmax.f32 %v1032_v24, %v1040_v31  ;;  %v1039_v34 = vsel %vm1021_vm3, %v1010_v25, -inf  ;;  %v1041_v35 = vsel %vm1021_vm3, %v1012_v26, -inf }
 0x2fe   : > { %v1078_v36 = vmax.f32 %v1031_v27, %v1039_v34  ;;  %v1092_v38 = vmax.f32 %v1033_v28, %v1041_v35 }
 0x2ff   : > { %v1072_v39 = vrot.slane %v1071_v32, 4  ;;  %v1086_v17 = vrot.slane %v1085_v33, 4 }
 0x300   : > { %v1079_v47 = vrot.slane %v1078_v36, 4  ;;  %v1093_v63 = vrot.slane %v1092_v38, 4 }
 0x301   : > { %v1073_v41 = vmax.f32 %v1071_v32, %v1072_v39  ;;  %v1087_v30 = vmax.f32 %v1085_v33, %v1086_v17 }
 0x302   : > { %v1080_v42 = vmax.f32 %v1078_v36, %v1079_v47  ;;  %v1094_v43 = vmax.f32 %v1092_v38, %v1093_v63 }
 0x303   : > { %v1074_v44 = vrot.slane %v1073_v41, 2  ;;  %v1088_v45 = vrot.slane %v1087_v30, 2 }
 0x304   : > { %v1081_v46 = vrot.slane %v1080_v42, 2  ;;  %v1095_v48 = vrot.slane %v1094_v43, 2 }
 0x305   : > { %v1075_v49 = vmax.f32 %v1073_v41, %v1074_v44  ;;  %v1089_v51 = vmax.f32 %v1087_v30, %v1088_v45 }
 0x306   : > { %v1082_v52 = vmax.f32 %v1080_v42, %v1081_v46  ;;  %v1096_v53 = vmax.f32 %v1094_v43, %v1095_v48 }
 0x307   : > { %v1076_v55 = vrot.slane %v1075_v49, 1  ;;  %v1090_v54 = vrot.slane %v1089_v51, 1 }
 0x308   : > { %v1083_v56 = vrot.slane %v1082_v52, 1  ;;  %v1097_v57 = vrot.slane %v1096_v53, 1 }
 0x309   : > { %v1077_v60 = vmax.f32 %v1075_v49, %v1076_v55  ;;  %v1091_v61 = vmax.f32 %v1089_v51, %v1090_v54 }
 0x30a   : > { %v1084_v0 = vmax.f32 %v1082_v52, %v1083_v56  ;;  %v1098_v1 = vmax.f32 %v1096_v53, %v1097_v57 }
 0x30c   : > { %v1109_v2 = vcombine.low %v1077_v60, %v1084_v0  ;;  %v1110_v3 = vcombine.low %v1091_v61, %v1098_v1 }
 0x30e   : > { %v1131_v37 = vrot.slane %v1109_v2, %v1956_v50  ;;  %v1138_v4 = vrot.slane %v1110_v3, %v1956_v50 }
 0x310   : > { %v1140_v5 = vcombine.low %v1131_v37, %v1138_v4 }
 0x312   : > { %v1154_v7 = vrot.slane %v1140_v5, %v1956_v50 }
 0x314   : > { %v1155_v9 = vcombine.low %v1147_v6, %v1154_v7 }
 0x316   : > { %v1157_v10 = vmax.f32 %v1042_v8, %v1155_v9 }
 0x318   : > { %1158 = vst [vmem:[%s1853_s10] sm:$0xff] %v1157_v10 }
 0x319   : > { %1603 = shalt.err (!%p1600_p11)
}
 0x31a   : > { %s1604_s10 = scalar_lea.hbm %s2003_s12, 128  ;;  %s1608_s27 = scalar_lea.hbm %s2066_s7, 256 }
 0x31b   : > { %p1605_p12 = scmp.ne.s32.totalorder %s2003_s12, %s1604_s10  ;;  %p1609_p3 = scmp.lt.u32.totalorder %s2003_s12, %s2066_s7 }
 0x31c   : > { %p1610_p9 = scmp.lt.u32.totalorder %s1608_s27, %s1604_s10  ;;  %p1612_p13 = scmp.lt.u32.totalorder %s1604_s10, %s2003_s12 }
 0x31d   : > { %p1606_p1 = pnand %p1605_p12, %p2083_p0 }
 0x31e   : > { %p1611_p10 = por %p1610_p9, %p1609_p3 }
 0x31f   : > { %p1607_p4 = pneg %p1606_p1 }
 0x320   : > { %p1613_p2 = por %p1612_p13, %p1611_p10 }
 0x322   : > { %p1614_p5 = pnand %p1613_p2, %p1607_p4 }
 0x324   : > { %1617 = shalt.err (!%p1614_p5)
}
 0x325   : > { %1479 = dma.vmem_to_hbm [thread:$0]  (%p2083_p0), %s2005_s13, 128, %s2003_s12, %s1160_s23  }
 0x326 PF: > { %p1491_p6 = scmp.ge.s32.totalorder %s1688_s8, 2  ;;  %s1186_s18 = sand.u32 1, %s1660_s24  }
 0x327   : > { %p2084_p7 = scmp.ne.s32.totalorder %s2076_s15, 0  ;;  %s1187_s9 = scalar_lea.sflag [#allocation4], %s1186_s18 }
 0x329   : > { %p1486_p8 = pnand %p1491_p6, %p2084_p7 }
 0x32b   : > { %1655 = dma.done.wait (!%p1486_p8), %s1187_s9, 128  }
 0x32c   : > { %1657 = vsyncadd (!%p1486_p8), %s1187_s9, 4294967168  ;;  %s21_s8 = sadd.s32 1, %s1688_s8   ;;  %s2085_s14 = sld [smem:[#allocation8_spill]] }
 0x32d   : > { %p18_p11 = scmp.ge.s32.totalorder %s21_s8, 8   ;;  %s2086_s13 = sld [smem:[#allocation9_spill]] }
 0x32e   : > { %s2087_s24 = smov %s1664_s25  ;;  %s2088_s25 = smov %s1668_s26 }
 0x32f   : > { %s2089_s26 = smov %s1814_s19  ;;  %s2090_s27 = smov %s1680_s29 }
 0x330   : > { %s2091_s28 = smov %s1684_s30  ;;  %20 = sbr.rel (!%p18_p11) target bundleno = 6 (0x6), region = 92 }
 0x332   : > { %s2092_s29 = smov %s2085_s14 }
 0x333   : > { %s2093_s30 = smov %s2086_s13 }
 0x337   :  { %1192 = vsyncpa [#allocation3], 1 }
 0x338   :  { %1194 = vsyncpa [#allocation3 + $0x1], 1 }
 0x339   :  { %1195 = vsyncpa [#allocation4], 1 }
 0x33a   :  { %1197 = vsyncpa [#allocation4 + $0x1], 1 }

</bundles_post_ra>
